<compile_context>
chip_gen: v6e
topology: v6e:2x2x1
jax: 0.10.0
libtpu: 0.0.40
codegen_flags: <defaults>
</compile_context>

<pallas_src>
import jax
import jax.numpy as jnp
from jax.experimental import pallas as pl
from jax.experimental.pallas import tpu as pltpu


def _round_up(x, m):
    return ((x + m - 1) // m) * m


def _vmem_budget_bytes():
    """Per-generation scoped-VMEM budget (~75% of physical VMEM, capped)."""
    cap = None
    try:
        info = pltpu.get_tpu_info()
        cap = getattr(info, "vmem_capacity_bytes", None)
    except Exception:
        cap = None
    if not cap:
        cap = 64 * 1024 * 1024          # conservative default (v7x per-TC)
    return int(min(cap * 3 // 4, 100 * 1024 * 1024))


# ---------------------------------------------------------------------------
# GraphSAGEConv:  relu((adj @ x) @ W)
# ---------------------------------------------------------------------------
def _sage_conv_resident_kernel(adj_ref, x_ref, w_ref, out_ref):
    # x and W are fully VMEM-resident (constant index maps); only adj streams.
    agg = jnp.dot(adj_ref[...], x_ref[...], preferred_element_type=jnp.float32)
    out = jnp.dot(agg.astype(w_ref.dtype), w_ref[...],
                  preferred_element_type=jnp.float32)
    out_ref[...] = jnp.maximum(out, 0.0).astype(out_ref.dtype)


def _sage_conv_ktiled_kernel(adj_ref, x_ref, w_ref, out_ref, acc_ref):
    k = pl.program_id(1)

    @pl.when(k == 0)
    def _():
        acc_ref[...] = jnp.zeros_like(acc_ref)

    acc_ref[...] += jnp.dot(adj_ref[...], x_ref[...],
                            preferred_element_type=jnp.float32)

    @pl.when(k == pl.num_programs(1) - 1)
    def _():
        out = jnp.dot(acc_ref[...].astype(w_ref.dtype), w_ref[...],
                      preferred_element_type=jnp.float32)
        out_ref[...] = jnp.maximum(out, 0.0).astype(out_ref.dtype)


def sage_conv(adj, x, w, *, vmem_budget=None):
    """relu((adj @ x) @ w). Inputs must be tile aligned:
    adj (Np, Np), x (Np, Fin), w (Fin, Fout), Np/Fin/Fout % 128 == 0."""
    n = adj.shape[0]
    fin = x.shape[1]
    fout = w.shape[1]
    assert adj.shape == (n, n) and x.shape == (n, fin) and w.shape == (fin, fout)
    assert n % 128 == 0 and fin % 128 == 0 and fout % 128 == 0
    if vmem_budget is None:
        vmem_budget = _vmem_budget_bytes()

    itemsize = jnp.dtype(adj.dtype).itemsize
    out_itemsize = jnp.dtype(x.dtype).itemsize
    x_bytes = n * fin * itemsize
    w_bytes = fin * fout * itemsize

    cost = pl.CostEstimate(
        flops=2 * n * n * fin + 2 * n * fin * fout,
        transcendentals=0,
        bytes_accessed=(adj.size + x.size + w.size) * itemsize
        + n * fout * out_itemsize,
    )

    # ---- preferred path: x and W fully resident, adj streamed once ---------
    def _resident_fits(tm):
        return (2 * (tm * n * itemsize + tm * fout * out_itemsize)
                + 2 * (x_bytes + w_bytes)) <= vmem_budget

    tm_res = None
    for cand in (512, 256, 128, 64, 32, 16, 8):
        if n % cand == 0 and _resident_fits(cand):
            tm_res = cand
            break

    if tm_res is not None:
        return pl.pallas_call(
            _sage_conv_resident_kernel,
            out_shape=jax.ShapeDtypeStruct((n, fout), x.dtype),
            grid_spec=pltpu.PrefetchScalarGridSpec(
                num_scalar_prefetch=0,
                grid=(n // tm_res,),
                in_specs=[
                    pl.BlockSpec((tm_res, n), lambda i: (i, 0)),
                    pl.BlockSpec((n, fin), lambda i: (0, 0)),      # resident
                    pl.BlockSpec((fin, fout), lambda i: (0, 0)),   # resident
                ],
                out_specs=pl.BlockSpec((tm_res, fout), lambda i: (i, 0)),
            ),
            compiler_params=pltpu.CompilerParams(
                dimension_semantics=("parallel",),
                vmem_limit_bytes=vmem_budget,
            ),
            cost_estimate=cost,
        )(adj, x, w)

    # ---- fallback: K-tiled aggregation (x streamed per row tile) -----------
    # TODO(synk): add an fout grid axis to tile W when fin/fout exceed ~2K so
    # the full (fin, fout) W block is not held double-buffered in VMEM.
    def _ktiled_fits(tm, tk):
        return (2 * (tm * tk + tk * fin + fin * fout) * itemsize
                + 2 * tm * fout * out_itemsize
                + tm * fin * 4) <= vmem_budget

    tm = tk = None
    for cm in (512, 256, 128, 64, 32, 16, 8):
        if n % cm:
            continue
        for ck in (1024, 512, 256, 128):
            if n % ck:
                continue
            if _ktiled_fits(cm, ck):
                tm, tk = cm, ck
                break
        if tm is not None:
            break
    assert tm is not None, "feature dims too large for untiled-W sage_conv"

    return pl.pallas_call(
        _sage_conv_ktiled_kernel,
        out_shape=jax.ShapeDtypeStruct((n, fout), x.dtype),
        grid_spec=pltpu.PrefetchScalarGridSpec(
            num_scalar_prefetch=0,
            grid=(n // tm, n // tk),
            in_specs=[
                pl.BlockSpec((tm, tk), lambda i, k: (i, k)),
                pl.BlockSpec((tk, fin), lambda i, k: (k, 0)),
                pl.BlockSpec((fin, fout), lambda i, k: (0, 0)),
            ],
            out_specs=pl.BlockSpec((tm, fout), lambda i, k: (i, 0)),
            scratch_shapes=[pltpu.VMEM((tm, fin), jnp.float32)],
        ),
        compiler_params=pltpu.CompilerParams(
            dimension_semantics=("parallel", "arbitrary"),
            vmem_limit_bytes=vmem_budget,
        ),
        cost_estimate=cost,
    )(adj, x, w)


# ---------------------------------------------------------------------------
# Decoder:  (HR @ train_W) @ HD.T
# ---------------------------------------------------------------------------
def _decoder_kernel(supp_ref, hdT_ref, out_ref):
    out_ref[...] = jnp.dot(supp_ref[...], hdT_ref[...],
                           preferred_element_type=jnp.float32
                           ).astype(out_ref.dtype)


def decoder_apply(H, W_pad, drug_num, target_num, *, compute_dtype,
                  vmem_budget=None):
    """Pallas Decoder. H: (Np, hpad) conv-2 output (already feature-padded);
    W_pad: (hpad, hpad) padded bilinear weight."""
    if vmem_budget is None:
        vmem_budget = _vmem_budget_bytes()

    n, hpad = H.shape
    assert W_pad.shape == (hpad, hpad) and hpad % 128 == 0

    dpad = _round_up(drug_num, 8)          # sublane-aligned rows
    tpad = _round_up(target_num, 128)      # lane-dense output last dim

    HR = jax.lax.slice(H, (0, 0), (drug_num, hpad))
    HD = jax.lax.slice(H, (drug_num, 0), (drug_num + target_num, hpad))
    HR = jnp.pad(HR, ((0, dpad - drug_num), (0, 0)))
    # Pre-transpose HD once in XLA (layout plumbing) so the kernel contracts
    # on natural dims — no per-tile XLU transposes inside the kernel.
    HD_T = jnp.transpose(
        jnp.pad(HD, ((0, tpad - target_num), (0, 0)))).astype(compute_dtype)

    # supp1 = HR @ train_W hoisted out of the kernel (tiny dpad x hpad x hpad
    # matmul). Removes the j==0 scratch dependency, so both decoder grid axes
    # are "parallel" (v7x megacore), and the per-j f32->bf16 cast disappears
    # (cast once here).
    supp = jnp.dot(HR.astype(jnp.float32), W_pad.astype(jnp.float32),
                   preferred_element_type=jnp.float32).astype(compute_dtype)

    itemsize = jnp.dtype(compute_dtype).itemsize

    # Keep HD_T fully resident per row tile when it fits; otherwise tile lanes.
    if 2 * hpad * tpad * itemsize <= vmem_budget // 4:
        tn = tpad
    elif tpad % 512 == 0:
        tn = 512
    elif tpad % 256 == 0:
        tn = 256
    else:
        tn = 128

    tm = 8
    for cand in (512, 256, 128, 64, 32, 16, 8):
        if dpad % cand:
            continue
        fits = (2 * (cand * hpad + hpad * tn) * itemsize
                + 2 * cand * tn * 4) <= vmem_budget
        if fits:
            tm = cand
            break

    cost = pl.CostEstimate(
        flops=2 * dpad * tpad * hpad,
        transcendentals=0,
        bytes_accessed=(supp.size + HD_T.size) * itemsize + dpad * tpad * 4,
    )

    out = pl.pallas_call(
        _decoder_kernel,
        out_shape=jax.ShapeDtypeStruct((dpad, tpad), jnp.float32),
        grid_spec=pltpu.PrefetchScalarGridSpec(
            num_scalar_prefetch=0,
            grid=(dpad // tm, tpad // tn),
            in_specs=[
                pl.BlockSpec((tm, hpad), lambda i, j: (i, 0)),
                pl.BlockSpec((hpad, tn), lambda i, j: (0, j)),
            ],
            out_specs=pl.BlockSpec((tm, tn), lambda i, j: (i, j)),
        ),
        compiler_params=pltpu.CompilerParams(
            dimension_semantics=("parallel", "parallel"),
            vmem_limit_bytes=vmem_budget,
        ),
        cost_estimate=cost,
    )(supp, HD_T)

    return jax.lax.slice(out, (0, 0), (drug_num, target_num))


# ---------------------------------------------------------------------------
# Fully fused single-kernel path for small graphs (everything fits VMEM)
# ---------------------------------------------------------------------------
def _fused_small_kernel(adj_ref, x_ref, w1_ref, w2_ref, tw_ref, out_ref):
    adj = adj_ref[...]
    cdt = adj.dtype
    h1 = jnp.dot(adj, x_ref[...], preferred_element_type=jnp.float32)
    h1 = jnp.maximum(
        jnp.dot(h1.astype(cdt), w1_ref[...], preferred_element_type=jnp.float32),
        0.0).astype(cdt)
    h2 = jnp.dot(adj, h1, preferred_element_type=jnp.float32)
    h2 = jnp.maximum(
        jnp.dot(h2.astype(cdt), w2_ref[...], preferred_element_type=jnp.float32),
        0.0).astype(cdt)
    supp = jnp.dot(h2, tw_ref[...], preferred_element_type=jnp.float32)
    # Full (n, n) bilinear score matrix; HR/HD row/col slicing happens in the
    # wrapper. One NT contraction of one small tile only.
    out = jax.lax.dot_general(supp.astype(cdt), h2,
                              dimension_numbers=(((1,), (1,)), ((), ())),
                              preferred_element_type=jnp.float32)
    out_ref[...] = out.astype(out_ref.dtype)


# ---------------------------------------------------------------------------
# prepare (one-time pad/cast, cache across calls) + apply (per-step forward)
# ---------------------------------------------------------------------------
def prepare_graphsage_inputs(node_features, adjacency_matrix, W1, W2, train_W,
                             *, compute_dtype=None):
    """Pad + cast once. Cache the result across forward calls: re-padding the
    bf16 adjacency every step is a full extra HBM pass of the largest array."""
    if compute_dtype is None:
        compute_dtype = node_features.dtype

    n, fin = node_features.shape
    hidden = W1.shape[1]
    fout = W2.shape[1]
    assert adjacency_matrix.shape == (n, n)
    assert W2.shape[0] == hidden and train_W.shape == (fout, fout)

    npad = _round_up(n, 128)
    fin_p = _round_up(fin, 128)
    hid_p = _round_up(hidden, 128)
    out_p = _round_up(fout, 128)

    return dict(
        adj=jnp.pad(adjacency_matrix,
                    ((0, npad - n), (0, npad - n))).astype(compute_dtype),
        x=jnp.pad(node_features,
                  ((0, npad - n), (0, fin_p - fin))).astype(compute_dtype),
        w1=jnp.pad(W1, ((0, fin_p - fin), (0, hid_p - hidden))).astype(compute_dtype),
        w2=jnp.pad(W2, ((0, hid_p - hidden), (0, out_p - fout))).astype(compute_dtype),
        train_w=jnp.pad(train_W,
                        ((0, out_p - fout), (0, out_p - fout))).astype(compute_dtype),
        compute_dtype=compute_dtype,
    )


def graphsage_autoencoder_apply(prepared, drug_num, target_num, *,
                                force_tiled=False):
    adj, x = prepared["adj"], prepared["x"]
    w1, w2, tw = prepared["w1"], prepared["w2"], prepared["train_w"]
    compute_dtype = prepared["compute_dtype"]
    budget = _vmem_budget_bytes()

    npad = adj.shape[0]
    itemsize = jnp.dtype(compute_dtype).itemsize
    fused_bytes = (itemsize * (adj.size + x.size + w1.size + w2.size + tw.size)
                   + 4 * npad * (x.shape[1] + w1.shape[1] + w2.shape[1] + npad)
                   + 4 * npad * npad)

    if (not force_tiled) and npad <= 1024 and 2 * fused_bytes <= budget:
        # Small graph: one fused kernel (both convs + decoder), no pipelining
        # overhead, everything VMEM-resident.
        out = pl.pallas_call(
            _fused_small_kernel,
            out_shape=jax.ShapeDtypeStruct((npad, npad), jnp.float32),
            compiler_params=pltpu.CompilerParams(vmem_limit_bytes=budget),
        )(adj, x, w1, w2, tw)
        return jax.lax.slice(out, (0, drug_num),
                             (drug_num, drug_num + target_num))

    h1 = sage_conv(adj, x, w1, vmem_budget=budget)      # relu fused
    h2 = sage_conv(adj, h1, w2, vmem_budget=budget)     # relu fused
    return decoder_apply(h2, tw, drug_num, target_num,
                         compute_dtype=compute_dtype, vmem_budget=budget)


def graphsage_autoencoder_forward(node_features, adjacency_matrix, W1, W2,
                                  train_W, drug_num, target_num, *,
                                  dropout=0.0, training=False,
                                  compute_dtype=None, force_tiled=False):
    """GraphSAGE_autoencoder.forward (inference path). For repeated calls on a
    static graph, use prepare_graphsage_inputs() once + graphsage_autoencoder_apply()."""
    # dropout: F.dropout(..., training=False) is the identity in inference.
    # TODO(synk): training-mode dropout (pltpu.prng_*) and the fgm adversarial
    # attack/restore hooks are training-time only and not implemented here.
    assert not training
    del dropout
    prepared = prepare_graphsage_inputs(node_features, adjacency_matrix, W1, W2,
                                        train_W, compute_dtype=compute_dtype)
    return graphsage_autoencoder_apply(prepared, drug_num, target_num,
                                       force_tiled=force_tiled)


def graphsage_autoencoder_reference(node_features, adj, W1, W2, train_W,
                                    drug_num, target_num):
    hi = jax.lax.Precision.HIGHEST
    x = jnp.maximum(jnp.dot(jnp.dot(adj, node_features, precision=hi), W1,
                            precision=hi), 0.0)
    x = jnp.maximum(jnp.dot(jnp.dot(adj, x, precision=hi), W2,
                            precision=hi), 0.0)
    HR = x[:drug_num]
    HD = x[drug_num:drug_num + target_num]
    return jnp.dot(jnp.dot(HR, train_W, precision=hi), HD.T, precision=hi)


if __name__ == "__main__":
    key = jax.random.PRNGKey(0)
    k_x, k_a, k_w1, k_w2, k_tw = jax.random.split(key, 5)

    drug_num, target_num = 8, 8
    num_nodes = drug_num + target_num          # 16
    input_size, hidden_size, output_size = 48, 32, 32

    node_features = jax.random.normal(k_x, (num_nodes, input_size), jnp.float32)
    adj = jax.random.uniform(k_a, (num_nodes, num_nodes), jnp.float32)
    adj = adj / jnp.sum(adj, axis=1, keepdims=True)   # mean-style aggregator
    W1 = jax.random.normal(k_w1, (input_size, hidden_size), jnp.float32) * 0.1
    W2 = jax.random.normal(k_w2, (hidden_size, output_size), jnp.float32) * 0.1
    train_W = jax.random.normal(k_tw, (output_size, output_size), jnp.float32) * 0.1

    ref = graphsage_autoencoder_reference(node_features, adj, W1, W2, train_W,
                                          drug_num, target_num)

    # Prepare once (padded/cast operands cached across forward calls).
    prep32 = prepare_graphsage_inputs(node_features, adj, W1, W2, train_W)

    # 1) Fused single-kernel small-graph path (f32 operands).
    out = graphsage_autoencoder_apply(prep32, drug_num, target_num)
    out = jax.block_until_ready(out)
    assert out.shape == (drug_num, target_num)
    assert jnp.allclose(out, ref, atol=2e-3, rtol=2e-3), \
        float(jnp.max(jnp.abs(out - ref)))

    # 2) General tiled path (conv x2 + decoder kernels), f32 operands.
    out_t = graphsage_autoencoder_apply(prep32, drug_num, target_num,
                                        force_tiled=True)
    out_t = jax.block_until_ready(out_t)
    assert jnp.allclose(out_t, ref, atol=2e-3, rtol=2e-3), \
        float(jnp.max(jnp.abs(out_t - ref)))

    # 3) bf16 operand path (full MXU-rate on v5e/v6e/v7x), f32 accumulation.
    prep_bf16 = prepare_graphsage_inputs(node_features, adj, W1, W2, train_W,
                                         compute_dtype=jnp.bfloat16)
    out_bf16 = graphsage_autoencoder_apply(prep_bf16, drug_num, target_num,
                                           force_tiled=True)
    out_bf16 = jax.block_until_ready(out_bf16)
    rel = jnp.linalg.norm(out_bf16.astype(jnp.float32) - ref) / \
        (jnp.linalg.norm(ref) + 1e-6)
    assert out_bf16.shape == (drug_num, target_num)
    assert float(rel) < 8e-2, float(rel)

    print("KERNEL_OK")
</pallas_src>

<mosaic_0001>
module attributes {stable_mosaic.version = 11 : i64} {
  func.func @_fused_small_kernel(%arg0: memref<128x128xf32, #tpu.memory_space<vmem>>, %arg1: memref<128x128xf32, #tpu.memory_space<vmem>>, %arg2: memref<128x128xf32, #tpu.memory_space<vmem>>, %arg3: memref<128x128xf32, #tpu.memory_space<vmem>>, %arg4: memref<128x128xf32, #tpu.memory_space<vmem>>, %arg5: memref<128x128xf32, #tpu.memory_space<vmem>>) attributes {dimension_semantics = [], scalar_prefetch = 0 : i64, scratch_operands = 0 : i64, tpu.core_type = #tpu.core_type<tc>} {
    %c0 = arith.constant 0 : index
    %c0_0 = arith.constant 0 : index
    %0 = vector.load %arg0[%c0, %c0_0] : memref<128x128xf32, #tpu.memory_space<vmem>>, vector<128x128xf32>
    %c0_1 = arith.constant 0 : index
    %c0_2 = arith.constant 0 : index
    %1 = vector.load %arg1[%c0_1, %c0_2] : memref<128x128xf32, #tpu.memory_space<vmem>>, vector<128x128xf32>
    %cst = arith.constant dense<0.000000e+00> : vector<128x128xf32>
    %2 = tpu.matmul %0, %1, %cst {dimension_numbers = #tpu.dot_dimension_numbers<[1], [0], [0], [1], [0, 0, 1, 1], [], []>} : vector<128x128xf32>, vector<128x128xf32>, vector<128x128xf32> -> vector<128x128xf32>
    %c0_3 = arith.constant 0 : index
    %c0_4 = arith.constant 0 : index
    %3 = vector.load %arg2[%c0_3, %c0_4] : memref<128x128xf32, #tpu.memory_space<vmem>>, vector<128x128xf32>
    %cst_5 = arith.constant dense<0.000000e+00> : vector<128x128xf32>
    %4 = tpu.matmul %2, %3, %cst_5 {dimension_numbers = #tpu.dot_dimension_numbers<[1], [0], [0], [1], [0, 0, 1, 1], [], []>} : vector<128x128xf32>, vector<128x128xf32>, vector<128x128xf32> -> vector<128x128xf32>
    %cst_6 = arith.constant 0.000000e+00 : f32
    %5 = vector.broadcast %cst_6 : f32 to vector<128x128xf32>
    %6 = arith.maximumf %4, %5 : vector<128x128xf32>
    %cst_7 = arith.constant dense<0.000000e+00> : vector<128x128xf32>
    %7 = tpu.matmul %0, %6, %cst_7 {dimension_numbers = #tpu.dot_dimension_numbers<[1], [0], [0], [1], [0, 0, 1, 1], [], []>} : vector<128x128xf32>, vector<128x128xf32>, vector<128x128xf32> -> vector<128x128xf32>
    %c0_8 = arith.constant 0 : index
    %c0_9 = arith.constant 0 : index
    %8 = vector.load %arg3[%c0_8, %c0_9] : memref<128x128xf32, #tpu.memory_space<vmem>>, vector<128x128xf32>
    %cst_10 = arith.constant dense<0.000000e+00> : vector<128x128xf32>
    %9 = tpu.matmul %7, %8, %cst_10 {dimension_numbers = #tpu.dot_dimension_numbers<[1], [0], [0], [1], [0, 0, 1, 1], [], []>} : vector<128x128xf32>, vector<128x128xf32>, vector<128x128xf32> -> vector<128x128xf32>
    %cst_11 = arith.constant 0.000000e+00 : f32
    %10 = vector.broadcast %cst_11 : f32 to vector<128x128xf32>
    %11 = arith.maximumf %9, %10 : vector<128x128xf32>
    %c0_12 = arith.constant 0 : index
    %c0_13 = arith.constant 0 : index
    %12 = vector.load %arg4[%c0_12, %c0_13] : memref<128x128xf32, #tpu.memory_space<vmem>>, vector<128x128xf32>
    %cst_14 = arith.constant dense<0.000000e+00> : vector<128x128xf32>
    %13 = tpu.matmul %11, %12, %cst_14 {dimension_numbers = #tpu.dot_dimension_numbers<[1], [0], [0], [1], [0, 0, 1, 1], [], []>} : vector<128x128xf32>, vector<128x128xf32>, vector<128x128xf32> -> vector<128x128xf32>
    %cst_15 = arith.constant dense<0.000000e+00> : vector<128x128xf32>
    %14 = tpu.matmul %13, %11, %cst_15 {dimension_numbers = #tpu.dot_dimension_numbers<[1], [1], [0], [0], [0, 0, 1, 0], [], []>} : vector<128x128xf32>, vector<128x128xf32>, vector<128x128xf32> -> vector<128x128xf32>
    %c0_16 = arith.constant 0 : index
    %c0_17 = arith.constant 0 : index
    %15 = vector.load %arg5[%c0_16, %c0_17] : memref<128x128xf32, #tpu.memory_space<vmem>>, vector<128x128xf32>
    tpu.vector_store %arg5[%c0_16, %c0_17], %14 {strides = array<i32>} : memref<128x128xf32, #tpu.memory_space<vmem>>, vector<128x128xf32>,
    return
  }
}

</mosaic_0001>

<bundles_post_ra>
// kernel: tpu_custom_call.1
= control target key start
LH: loop header
LB: loop body
LE: loop exit
PB: predicated region body
PF: predicated region fallthrough
CT: control target
= control target key end

     0   :  { %10 = vsyncpa [#allocation3], 0  ;;  %s1928_s0 = inlined_call_operand.hbm [shape: f32[128,128], index: 0, kind: input, shape index: {}]   ;;  %s1929_s1 = inlined_call_operand.hbm [shape: f32[128,128], index: 1, kind: input, shape index: {}]   ;;  %s1930_s2 = inlined_call_operand.hbm [shape: f32[128,128], index: 2, kind: input, shape index: {}]   ;;  %s1931_s3 = inlined_call_operand.hbm [shape: f32[128,128], index: 3, kind: input, shape index: {}]   ;;  %s1932_s4 = inlined_call_operand.hbm [shape: f32[128,128], index: 4, kind: input, shape index: {}]   ;;  %s1933_s5 = inlined_call_operand.hbm [shape: f32[128,128], index: 5, kind: output, shape index: {}]  }
   0x1   :  { %11 = vsyncpa [#allocation6], 0 }
   0x2   :  { %12 = vsyncpa [#allocation9], 0 }
   0x3   :  { %13 = vsyncpa [#allocation4], 0  ;;  %s1770_s18 = smov [#allocation5]   ;;  %s1771_s20 = smov [#allocation8]  }
   0x4   :  { %s31_s19 = sshll.u32 %s1770_s18, 4  ;;  %s55_s21 = sshll.u32 %s1771_s20, 4  ;;  %s32_s19 = int_to_ptr.vmem [resolvable:$true] %s31_s19  ;;  %s56_s21 = int_to_ptr.vmem [resolvable:$true] %s55_s21 }
   0x5   :  { %s1650_s22 = scalar_lea.vmem %s32_s19, 2048  ;;  %p1655_p1 = scmp.lt.s32.totalorder %s32_s19, %s32_s19 }
   0x6   :  { %p1651_p0 = scmp.ne.s32.totalorder %s32_s19, %s1650_s22  ;;  %p1656_p2 = scmp.lt.s32.totalorder %s1650_s22, %s1650_s22 }
   0x8   :  { %p1657_p3 = por %p1656_p2, %p1655_p1 }
   0xa   :  { %p1658_p4 = pnand %p1657_p3, %p1651_p0 }
   0xc   :  { %1661 = shalt.err (!%p1658_p4)
}
   0xd   :  { %s1772_s23 = smov 128   ;;  %s1773_s24 = smov 8  }
   0xe   :  { %37 = dma.hbm_to_vmem [thread:$0]  %s1929_s1, 2048, %s32_s19, [#allocation6], %s1772_s23, %s1772_s23, %s1773_s24  }
   0xf   :  { %s1670_s27 = scalar_lea.vmem %s56_s21, 2048  ;;  %p1675_p6 = scmp.lt.s32.totalorder %s56_s21, %s56_s21 }
  0x10   :  { %p1671_p5 = scmp.ne.s32.totalorder %s56_s21, %s1670_s27  ;;  %p1676_p7 = scmp.lt.s32.totalorder %s1670_s27, %s1670_s27 }
  0x12   :  { %p1677_p8 = por %p1676_p7, %p1675_p6 }
  0x14   :  { %p1678_p9 = pnand %p1677_p8, %p1671_p5 }
  0x16   :  { %1681 = shalt.err (!%p1678_p9)
}
  0x17   :  { %61 = dma.hbm_to_vmem [thread:$0]  %s1931_s3, 2048, %s56_s21, [#allocation9], %s1772_s23, %s1772_s23, %s1773_s24  }
  0x18   :  { %s1774_s30 = smov [#allocation2]   ;;  %s1775_s7 = smov [#allocation7]  }
  0x19   :  { %s19_s6 = sshll.u32 %s1774_s30, 4  ;;  %s43_s8 = sshll.u32 %s1775_s7, 4  ;;  %s20_s6 = int_to_ptr.vmem [resolvable:$true] %s19_s6  ;;  %s44_s8 = int_to_ptr.vmem [resolvable:$true] %s43_s8 }
  0x1a   :  { %s1690_s1 = scalar_lea.vmem %s20_s6, 2048  ;;  %p1695_p11 = scmp.lt.s32.totalorder %s20_s6, %s20_s6 }
  0x1b   :  { %p1691_p10 = scmp.ne.s32.totalorder %s20_s6, %s1690_s1  ;;  %p1696_p12 = scmp.lt.s32.totalorder %s1690_s1, %s1690_s1 }
  0x1d   :  { %p1697_p13 = por %p1696_p12, %p1695_p11 }
  0x1f   :  { %p1698_p0 = pnand %p1697_p13, %p1691_p10 }
  0x21   :  { %1701 = shalt.err (!%p1698_p0)
}
  0x22   :  { %25 = dma.hbm_to_vmem [thread:$0]  %s1928_s0, 2048, %s20_s6, [#allocation3], %s1772_s23, %s1772_s23, %s1773_s24  }
  0x23   :  { %s1710_s3 = scalar_lea.vmem %s44_s8, 2048  ;;  %p1715_p2 = scmp.lt.s32.totalorder %s44_s8, %s44_s8 }
  0x24   :  { %p1711_p1 = scmp.ne.s32.totalorder %s44_s8, %s1710_s3  ;;  %p1716_p3 = scmp.lt.s32.totalorder %s1710_s3, %s1710_s3 }
  0x26   :  { %p1717_p4 = por %p1716_p3, %p1715_p2 }
  0x28   :  { %p1718_p5 = pnand %p1717_p4, %p1711_p1 }
  0x2a   :  { %1721 = shalt.err (!%p1718_p5)
}
  0x2b   :  { %49 = dma.hbm_to_vmem [thread:$0]  %s1930_s2, 2048, %s44_s8, [#allocation6], %s1772_s23, %s1772_s23, %s1773_s24  }
  0x2c   :  { %s1776_s13 = smov [#allocation10]  }
  0x2d   :  { %s67_s14 = sshll.u32 %s1776_s13, 4  ;;  %s68_s14 = int_to_ptr.vmem [resolvable:$true] %s67_s14 }
  0x2e   :  { %s1730_s15 = scalar_lea.vmem %s68_s14, 2048  ;;  %p1735_p7 = scmp.lt.s32.totalorder %s68_s14, %s68_s14 }
  0x2f   :  { %p1731_p6 = scmp.ne.s32.totalorder %s68_s14, %s1730_s15  ;;  %p1736_p8 = scmp.lt.s32.totalorder %s1730_s15, %s1730_s15 }
  0x31   :  { %p1737_p9 = por %p1736_p8, %p1735_p7 }
  0x33   :  { %p1738_p10 = pnand %p1737_p9, %p1731_p6 }
  0x35   :  { %1741 = shalt.err (!%p1738_p10)
}
  0x36   :  { %73 = dma.hbm_to_vmem [thread:$0]  %s1932_s4, 2048, %s68_s14, [#allocation9], %s1772_s23, %s1772_s23, %s1773_s24  }
  0x37   :  { %1762 = dma.done.wait [#allocation3], 2048  }
  0x38   :  { %1763 = vsyncadd [#allocation3], 4294965248 }
  0x39   :  { %1764 = dma.done.wait [#allocation6], 4096  }
  0x3a   :  { %1765 = vsyncadd [#allocation6], 4294963200 }
  0x3b   :  { %1766 = dma.done.wait [#allocation9], 4096  }
  0x3c   :  { %1767 = vsyncadd [#allocation9], 4294963200  ;;  %v120_v0 = vld [vmem:[#allocation5 + $0x78] sm:$0xff]  ;;  %v119_v1 = vld [vmem:[#allocation5 + $0x70] sm:$0xff]  ;;  %s1777_s2 = smov [#allocation11]  }
  0x3d   :  { %1298 = vmatprep.subr.mxu0 %v120_v0  ;;  %v118_v2 = vld [vmem:[#allocation5 + $0x68] sm:$0xff]  ;;  %v117_v3 = vld [vmem:[#allocation5 + $0x60] sm:$0xff]  ;;  %v116_v5 = vld [vmem:[#allocation5 + $0x58] sm:$0xff]  ;;  %s1092_s4 = sshll.u32 %s1777_s2, 4  ;;  %s1093_s4 = int_to_ptr.vmem [resolvable:$true] %s1092_s4 }
  0x3e   :  { %1299 = vmatpush3.msra.mxu0 %v120_v0  ;;  %v1838_v4 = vld [vmem:[#allocation2] sm:$0xff]  ;;  %v115_v6 = vld [vmem:[#allocation5 + $0x50] sm:$0xff]  ;;  %v114_v7 = vld [vmem:[#allocation5 + $0x48] sm:$0xff]  ;;  %s1742_s17 = scalar_lea.vmem %s1093_s4, 2048  ;;  %p1747_p12 = scmp.lt.s32.totalorder %s1093_s4, %s1093_s4 }
  0x3f   :  { %1300 = vmatprep.subr.mxu0 %v119_v1  ;;  %1330 = vmatprep.mubr.f32.mxu0 %v1838_v4  ;;  %v281_v8 = vld [vmem:[#allocation7 + $0x78] sm:$0xff]  ;;  %v280_v9 = vld [vmem:[#allocation7 + $0x70] sm:$0xff]  ;;  %v113_v10 = vld [vmem:[#allocation5 + $0x40] sm:$0xff]  ;;  %p1743_p11 = scmp.ne.s32.totalorder %s1093_s4, %s1742_s17  ;;  %p1748_p13 = scmp.lt.s32.totalorder %s1742_s17, %s1742_s17 }
  0x40   :  { %1301 = vmatpush3.msra.mxu0 %v119_v1  ;;  %1354 = vmatprep.subr.mxu1 %v281_v8  ;;  %v279_v11 = vld [vmem:[#allocation7 + $0x68] sm:$0xff]  ;;  %v112_v12 = vld [vmem:[#allocation5 + $0x38] sm:$0xff]  ;;  %v278_v13 = vld [vmem:[#allocation7 + $0x60] sm:$0xff] }
  0x41   :  { %1302 = vmatprep.subr.mxu0 %v118_v2  ;;  %1355 = vmatpush3.msra.mxu1 %v281_v8  ;;  %v111_v14 = vld [vmem:[#allocation5 + $0x30] sm:$0xff]  ;;  %v277_v15 = vld [vmem:[#allocation7 + $0x58] sm:$0xff]  ;;  %v110_v16 = vld [vmem:[#allocation5 + $0x28] sm:$0xff]  ;;  %p1749_p0 = por %p1748_p13, %p1747_p12 }
  0x42   :  { %1303 = vmatpush3.msra.mxu0 %v118_v2  ;;  %1356 = vmatprep.subr.mxu1 %v280_v9  ;;  %v276_v17 = vld [vmem:[#allocation7 + $0x50] sm:$0xff]  ;;  %v109_v18 = vld [vmem:[#allocation5 + $0x20] sm:$0xff]  ;;  %v275_v19 = vld [vmem:[#allocation7 + $0x48] sm:$0xff] }
  0x43   :  { %1304 = vmatprep.subr.mxu0 %v117_v3  ;;  %1357 = vmatpush3.msra.mxu1 %v280_v9  ;;  %v108_v20 = vld [vmem:[#allocation5 + $0x18] sm:$0xff]  ;;  %v274_v21 = vld [vmem:[#allocation7 + $0x40] sm:$0xff]  ;;  %v107_v22 = vld [vmem:[#allocation5 + $0x10] sm:$0xff]  ;;  %p1750_p1 = pnand %p1749_p0, %p1743_p11 }
  0x44   :  { %1305 = vmatpush3.msra.mxu0 %v117_v3  ;;  %1358 = vmatprep.subr.mxu1 %v279_v11  ;;  %v273_v23 = vld [vmem:[#allocation7 + $0x38] sm:$0xff]  ;;  %v106_v24 = vld [vmem:[#allocation5 + $0x8] sm:$0xff]  ;;  %v272_v25 = vld [vmem:[#allocation7 + $0x30] sm:$0xff] }
  0x45   :  { %1306 = vmatprep.subr.mxu0 %v116_v5  ;;  %1359 = vmatpush3.msra.mxu1 %v279_v11  ;;  %v105_v26 = vld [vmem:[#allocation5] sm:$0xff]  ;;  %v271_v27 = vld [vmem:[#allocation7 + $0x28] sm:$0xff]  ;;  %v1843_v30 = vld [vmem:[#allocation2 + $0x10] sm:$0xff] }
  0x46   :  { %1307 = vmatpush3.msra.mxu0 %v116_v5  ;;  %1360 = vmatprep.subr.mxu1 %v278_v13  ;;  %v1841_v28 = vld [vmem:[#allocation2 + $0x8] sm:$0xff]  ;;  %v270_v29 = vld [vmem:[#allocation7 + $0x20] sm:$0xff]  ;;  %v269_v31 = vld [vmem:[#allocation7 + $0x18] sm:$0xff] }
  0x47   :  { %1308 = vmatprep.subr.mxu0 %v115_v6  ;;  %1361 = vmatpush3.msra.mxu1 %v278_v13  ;;  %v1847_v32 = vld [vmem:[#allocation2 + $0x18] sm:$0xff]  ;;  %v268_v33 = vld [vmem:[#allocation7 + $0x10] sm:$0xff]  ;;  %v1849_v34 = vld [vmem:[#allocation2 + $0x20] sm:$0xff] }
  0x48   :  { %1309 = vmatpush3.msra.mxu0 %v115_v6  ;;  %1362 = vmatprep.subr.mxu1 %v277_v15  ;;  %v1853_v35 = vld [vmem:[#allocation2 + $0x28] sm:$0xff]  ;;  %v1855_v36 = vld [vmem:[#allocation2 + $0x30] sm:$0xff]  ;;  %v1859_v37 = vld [vmem:[#allocation2 + $0x38] sm:$0xff] }
  0x49   :  { %1310 = vmatprep.subr.mxu0 %v114_v7  ;;  %1363 = vmatpush3.msra.mxu1 %v277_v15  ;;  %v1861_v38 = vld [vmem:[#allocation2 + $0x40] sm:$0xff]  ;;  %v1865_v39 = vld [vmem:[#allocation2 + $0x48] sm:$0xff]  ;;  %v1867_v40 = vld [vmem:[#allocation2 + $0x50] sm:$0xff] }
  0x4a   :  { %1311 = vmatpush3.msra.mxu0 %v114_v7  ;;  %1364 = vmatprep.subr.mxu1 %v276_v17  ;;  %v1871_v41 = vld [vmem:[#allocation2 + $0x58] sm:$0xff]  ;;  %v1873_v42 = vld [vmem:[#allocation2 + $0x60] sm:$0xff]  ;;  %v1877_v43 = vld [vmem:[#allocation2 + $0x68] sm:$0xff] }
  0x4b   :  { %1312 = vmatprep.subr.mxu0 %v113_v10  ;;  %1365 = vmatpush3.msra.mxu1 %v276_v17  ;;  %v1879_v44 = vld [vmem:[#allocation2 + $0x70] sm:$0xff]  ;;  %v1883_v45 = vld [vmem:[#allocation2 + $0x78] sm:$0xff]  ;;  %v267_v46 = vld [vmem:[#allocation7 + $0x8] sm:$0xff] }
  0x4c   :  { %1313 = vmatpush3.msra.mxu0 %v113_v10  ;;  %1366 = vmatprep.subr.mxu1 %v275_v19  ;;  %v266_v47 = vld [vmem:[#allocation7] sm:$0xff]  ;;  %v603_v0 = vld [vmem:[#allocation8 + $0x78] sm:$0xff]  ;;  %v602_v1 = vld [vmem:[#allocation8 + $0x70] sm:$0xff] }
  0x4d   :  { %1314 = vmatprep.subr.mxu0 %v112_v12  ;;  %1367 = vmatpush3.msra.mxu1 %v275_v19  ;;  %v601_v2 = vld [vmem:[#allocation8 + $0x68] sm:$0xff]  ;;  %v600_v3 = vld [vmem:[#allocation8 + $0x60] sm:$0xff]  ;;  %v598_v5 = vld [vmem:[#allocation8 + $0x50] sm:$0xff] }
  0x4e   :  { %1315 = vmatpush3.msra.mxu0 %v112_v12  ;;  %1368 = vmatprep.subr.mxu1 %v274_v21  ;;  %v597_v6 = vld [vmem:[#allocation8 + $0x48] sm:$0xff]  ;;  %v596_v7 = vld [vmem:[#allocation8 + $0x40] sm:$0xff]  ;;  %v595_v8 = vld [vmem:[#allocation8 + $0x38] sm:$0xff] }
  0x4f   :  { %1316 = vmatprep.subr.mxu0 %v111_v14  ;;  %1369 = vmatpush3.msra.mxu1 %v274_v21  ;;  %v594_v9 = vld [vmem:[#allocation8 + $0x30] sm:$0xff]  ;;  %v593_v10 = vld [vmem:[#allocation8 + $0x28] sm:$0xff]  ;;  %v592_v11 = vld [vmem:[#allocation8 + $0x20] sm:$0xff] }
  0x50   :  { %1317 = vmatpush3.msra.mxu0 %v111_v14  ;;  %1370 = vmatprep.subr.mxu1 %v273_v23  ;;  %v591_v12 = vld [vmem:[#allocation8 + $0x18] sm:$0xff]  ;;  %v590_v13 = vld [vmem:[#allocation8 + $0x10] sm:$0xff] }
  0x51   :  { %1318 = vmatprep.subr.mxu0 %v110_v16  ;;  %1371 = vmatpush3.msra.mxu1 %v273_v23 }
  0x52   :  { %1319 = vmatpush3.msra.mxu0 %v110_v16  ;;  %1372 = vmatprep.subr.mxu1 %v272_v25 }
  0x53   :  { %1320 = vmatprep.subr.mxu0 %v109_v18  ;;  %1373 = vmatpush3.msra.mxu1 %v272_v25 }
  0x54   :  { %1321 = vmatpush3.msra.mxu0 %v109_v18  ;;  %1374 = vmatprep.subr.mxu1 %v271_v27 }
  0x55   :  { %1322 = vmatprep.subr.mxu0 %v108_v20  ;;  %1375 = vmatpush3.msra.mxu1 %v271_v27 }
  0x56   :  { %1323 = vmatpush3.msra.mxu0 %v108_v20  ;;  %1376 = vmatprep.subr.mxu1 %v270_v29 }
  0x57   :  { %1324 = vmatprep.subr.mxu0 %v107_v22  ;;  %1377 = vmatpush3.msra.mxu1 %v270_v29 }
  0x58   :  { %1325 = vmatpush3.msra.mxu0 %v107_v22  ;;  %1378 = vmatprep.subr.mxu1 %v269_v31 }
  0x59   :  { %1326 = vmatprep.subr.mxu0 %v106_v24  ;;  %1379 = vmatpush3.msra.mxu1 %v269_v31 }
  0x5a   :  { %1327 = vmatpush3.msra.mxu0 %v106_v24  ;;  %1380 = vmatprep.subr.mxu1 %v268_v33 }
  0x5b   :  { %1328 = vmatprep.subr.mxu0 %v105_v26  ;;  %1381 = vmatpush3.msra.mxu1 %v268_v33 }
  0x5c   :  { %1329 = vmatpush3.msra.mxu0 %v105_v26  ;;  %1382 = vmatprep.subr.mxu1 %v267_v46 }
  0x5d   :  { %1331 = vmatmul.mubr.f32.vlgmr.msra.gmra.mxu0 %v1841_v28  ;;  %1383 = vmatpush3.msra.mxu1 %v267_v46 }
  0x5e   :  { %1333 = vmatprep.mubr.f32.mxu0 %v1843_v30  ;;  %1384 = vmatprep.subr.mxu1 %v266_v47 }
  0x5f   :  { %1385 = vmatpush3.msra.mxu1 %v266_v47 }
  0x60   :  { %1466 = vmatprep.subr.mxu1 %v603_v0 }
  0x61   :  { %1334 = vmatmul.mubr.f32.gmra.mxu0 %v1847_v32 }
  0x62   :  { %1336 = vmatprep.mubr.f32.mxu0 %v1849_v34 }
  0x65   :  { %1337 = vmatmul.mubr.f32.gmra.mxu0 %v1853_v35 }
  0x66   :  { %1339 = vmatprep.mubr.f32.mxu0 %v1855_v36 }
  0x69   :  { %1340 = vmatmul.mubr.f32.gmra.mxu0 %v1859_v37 }
  0x6a   :  { %1342 = vmatprep.mubr.f32.mxu0 %v1861_v38 }
  0x6d   :  { %1343 = vmatmul.mubr.f32.gmra.mxu0 %v1865_v39 }
  0x6e   :  { %1345 = vmatprep.mubr.f32.mxu0 %v1867_v40 }
  0x71   :  { %1346 = vmatmul.mubr.f32.gmra.mxu0 %v1871_v41 }
  0x72   :  { %1348 = vmatprep.mubr.f32.mxu0 %v1873_v42 }
  0x75   :  { %1349 = vmatmul.mubr.f32.gmra.mxu0 %v1877_v43 }
  0x76   :  { %1351 = vmatprep.mubr.f32.mxu0 %v1879_v44 }
  0x79   :  { %1352 = vmatmul.mubr.f32.gmra.mxu0 %v1883_v45 }
  0x7a   :  { %1442 = vmatprep.mubr.f32.mxu0 %v1838_v4  ;;  %v599_v4 = vld [vmem:[#allocation8 + $0x58] sm:$0xff] }
 0x11d   :  { %v1332_v48 = vpop.f32.mrf.mxu0 }
 0x11f   :  { %v187_v49 = vpop.f32.mrf.mxu0 }
 0x120   :  { %1386 = vmatprep.mubr.f32.mxu1 %v187_v49 }
 0x121   :  { %v1335_v50 = vpop.f32.mrf.mxu0  ;;  %1387 = vmatmul.mubr.f32.vlgmr.msra.gmra.mxu1 %v1332_v48 }
 0x122   :  { %1467 = vmatpush3.msra.mxu1 %v603_v0 }
 0x123   :  { %v197_v51 = vpop.f32.mrf.mxu0  ;;  %1468 = vmatprep.subr.mxu1 %v602_v1 }
 0x124   :  { %1389 = vmatprep.mubr.f32.mxu1 %v197_v51  ;;  %1469 = vmatpush3.msra.mxu1 %v602_v1 }
 0x125   :  { %v1338_v52 = vpop.f32.mrf.mxu0  ;;  %1390 = vmatmul.mubr.f32.gmra.mxu1 %v1335_v50  ;;  %1470 = vmatprep.subr.mxu1 %v601_v2 }
 0x126   :  { %1471 = vmatpush3.msra.mxu1 %v601_v2 }
 0x127   :  { %v207_v53 = vpop.f32.mrf.mxu0  ;;  %1472 = vmatprep.subr.mxu1 %v600_v3 }
 0x128   :  { %1392 = vmatprep.mubr.f32.mxu1 %v207_v53  ;;  %1473 = vmatpush3.msra.mxu1 %v600_v3 }
 0x129   :  { %v1341_v54 = vpop.f32.mrf.mxu0  ;;  %1393 = vmatmul.mubr.f32.gmra.mxu1 %v1338_v52  ;;  %1474 = vmatprep.subr.mxu1 %v599_v4 }
 0x12a   :  { %1475 = vmatpush3.msra.mxu1 %v599_v4 }
 0x12b   :  { %v217_v55 = vpop.f32.mrf.mxu0  ;;  %1476 = vmatprep.subr.mxu1 %v598_v5 }
 0x12c   :  { %1395 = vmatprep.mubr.f32.mxu1 %v217_v55  ;;  %1477 = vmatpush3.msra.mxu1 %v598_v5 }
 0x12d   :  { %v1344_v56 = vpop.f32.mrf.mxu0  ;;  %1396 = vmatmul.mubr.f32.gmra.mxu1 %v1341_v54  ;;  %1478 = vmatprep.subr.mxu1 %v597_v6 }
 0x12e   :  { %1479 = vmatpush3.msra.mxu1 %v597_v6 }
 0x12f   :  { %v227_v57 = vpop.f32.mrf.mxu0  ;;  %1480 = vmatprep.subr.mxu1 %v596_v7 }
 0x130   :  { %1398 = vmatprep.mubr.f32.mxu1 %v227_v57  ;;  %1481 = vmatpush3.msra.mxu1 %v596_v7 }
 0x131   :  { %v1347_v58 = vpop.f32.mrf.mxu0  ;;  %1399 = vmatmul.mubr.f32.gmra.mxu1 %v1344_v56  ;;  %1482 = vmatprep.subr.mxu1 %v595_v8 }
 0x132   :  { %1483 = vmatpush3.msra.mxu1 %v595_v8 }
 0x133   :  { %v237_v59 = vpop.f32.mrf.mxu0  ;;  %1484 = vmatprep.subr.mxu1 %v594_v9 }
 0x134   :  { %1401 = vmatprep.mubr.f32.mxu1 %v237_v59  ;;  %1485 = vmatpush3.msra.mxu1 %v594_v9 }
 0x135   :  { %v1350_v60 = vpop.f32.mrf.mxu0  ;;  %1402 = vmatmul.mubr.f32.gmra.mxu1 %v1347_v58  ;;  %1486 = vmatprep.subr.mxu1 %v593_v10 }
 0x136   :  { %1487 = vmatpush3.msra.mxu1 %v593_v10 }
 0x137   :  { %v247_v61 = vpop.f32.mrf.mxu0  ;;  %1488 = vmatprep.subr.mxu1 %v592_v11 }
 0x138   :  { %1404 = vmatprep.mubr.f32.mxu1 %v247_v61  ;;  %1489 = vmatpush3.msra.mxu1 %v592_v11 }
 0x139   :  { %v1353_v62 = vpop.f32.mrf.mxu0  ;;  %1405 = vmatmul.mubr.f32.gmra.mxu1 %v1350_v60  ;;  %1490 = vmatprep.subr.mxu1 %v591_v12 }
 0x13a   :  { %1491 = vmatpush3.msra.mxu1 %v591_v12 }
 0x13b   :  { %v257_v63 = vpop.f32.mrf.mxu0  ;;  %1492 = vmatprep.subr.mxu1 %v590_v13 }
 0x13c   :  { %1407 = vmatprep.mubr.f32.mxu1 %v257_v63  ;;  %1493 = vmatpush3.msra.mxu1 %v590_v13  ;;  %v767_v13 = vld [vmem:[#allocation10 + $0x10] sm:$0xff] }
 0x13d   :  { %1408 = vmatmul.mubr.f32.gmra.mxu1 %v1353_v62 }
 0x1e1   :  { %v1388_v14 = vpop.f32.mrf.mxu1 }
 0x1e2   :  { %v428_v59 = vmax.f32 %v1388_v14, 0.0  ;;  %v766_v14 = vld [vmem:[#allocation10 + $0x8] sm:$0xff] }
 0x1e3   :  { %v348_v15 = vpop.f32.mrf.mxu1 }
 0x1e4   :  { %v427_v60 = vmax.f32 %v348_v15, 0.0  ;;  %v765_v15 = vld [vmem:[#allocation10] sm:$0xff] }
 0x1e5   :  { %v1391_v16 = vpop.f32.mrf.mxu1 }
 0x1e6   :  { %v430_v57 = vmax.f32 %v1391_v16, 0.0 }
 0x1e7   :  { %v358_v17 = vpop.f32.mrf.mxu1 }
 0x1e8   :  { %v429_v58 = vmax.f32 %v358_v17, 0.0 }
 0x1e9   :  { %v1394_v18 = vpop.f32.mrf.mxu1 }
 0x1ea   :  { %v432_v55 = vmax.f32 %v1394_v18, 0.0 }
 0x1eb   :  { %v368_v19 = vpop.f32.mrf.mxu1 }
 0x1ec   :  { %v431_v56 = vmax.f32 %v368_v19, 0.0 }
 0x1ed   :  { %v1397_v20 = vpop.f32.mrf.mxu1 }
 0x1ee   :  { %v434_v53 = vmax.f32 %v1397_v20, 0.0 }
 0x1ef   :  { %v378_v21 = vpop.f32.mrf.mxu1 }
 0x1f0   :  { %v433_v54 = vmax.f32 %v378_v21, 0.0 }
 0x1f1   :  { %v1400_v22 = vpop.f32.mrf.mxu1 }
 0x1f2   :  { %v436_v51 = vmax.f32 %v1400_v22, 0.0 }
 0x1f3   :  { %v388_v23 = vpop.f32.mrf.mxu1 }
 0x1f4   :  { %v435_v52 = vmax.f32 %v388_v23, 0.0 }
 0x1f5   :  { %v1403_v24 = vpop.f32.mrf.mxu1 }
 0x1f6   :  { %v438_v49 = vmax.f32 %v1403_v24, 0.0 }
 0x1f7   :  { %v398_v25 = vpop.f32.mrf.mxu1 }
 0x1f8   :  { %v437_v50 = vmax.f32 %v398_v25, 0.0 }
 0x1f9   :  { %v1406_v26 = vpop.f32.mrf.mxu1 }
 0x1fa   :  { %v440_v47 = vmax.f32 %v1406_v26, 0.0 }
 0x1fb   :  { %v408_v27 = vpop.f32.mrf.mxu1 }
 0x1fc   :  { %v439_v48 = vmax.f32 %v408_v27, 0.0 }
 0x1fd   :  { %v1409_v29 = vpop.f32.mrf.mxu1 }
 0x1fe   :  { %v442_v31 = vmax.f32 %v1409_v29, 0.0 }
 0x1ff   :  { %v418_v33 = vpop.f32.mrf.mxu1 }
 0x200   :  { %v441_v46 = vmax.f32 %v418_v33, 0.0  ;;  %1410 = vmatprep.subr.mxu0 %v442_v31 }
 0x201   :  { %1411 = vmatpush3.msra.mxu0 %v442_v31 }
 0x202   :  { %1412 = vmatprep.subr.mxu0 %v441_v46 }
 0x203   :  { %1413 = vmatpush3.msra.mxu0 %v441_v46 }
 0x204   :  { %1414 = vmatprep.subr.mxu0 %v440_v47 }
 0x205   :  { %1415 = vmatpush3.msra.mxu0 %v440_v47 }
 0x206   :  { %1416 = vmatprep.subr.mxu0 %v439_v48 }
 0x207   :  { %1417 = vmatpush3.msra.mxu0 %v439_v48 }
 0x208   :  { %1418 = vmatprep.subr.mxu0 %v438_v49 }
 0x209   :  { %1419 = vmatpush3.msra.mxu0 %v438_v49 }
 0x20a   :  { %1420 = vmatprep.subr.mxu0 %v437_v50 }
 0x20b   :  { %1421 = vmatpush3.msra.mxu0 %v437_v50 }
 0x20c   :  { %1422 = vmatprep.subr.mxu0 %v436_v51 }
 0x20d   :  { %1423 = vmatpush3.msra.mxu0 %v436_v51 }
 0x20e   :  { %1424 = vmatprep.subr.mxu0 %v435_v52 }
 0x20f   :  { %1425 = vmatpush3.msra.mxu0 %v435_v52 }
 0x210   :  { %1426 = vmatprep.subr.mxu0 %v434_v53 }
 0x211   :  { %1427 = vmatpush3.msra.mxu0 %v434_v53 }
 0x212   :  { %1428 = vmatprep.subr.mxu0 %v433_v54 }
 0x213   :  { %1429 = vmatpush3.msra.mxu0 %v433_v54 }
 0x214   :  { %1430 = vmatprep.subr.mxu0 %v432_v55 }
 0x215   :  { %1431 = vmatpush3.msra.mxu0 %v432_v55 }
 0x216   :  { %1432 = vmatprep.subr.mxu0 %v431_v56 }
 0x217   :  { %1433 = vmatpush3.msra.mxu0 %v431_v56 }
 0x218   :  { %1434 = vmatprep.subr.mxu0 %v430_v57 }
 0x219   :  { %1435 = vmatpush3.msra.mxu0 %v430_v57 }
 0x21a   :  { %1436 = vmatprep.subr.mxu0 %v429_v58 }
 0x21b   :  { %1437 = vmatpush3.msra.mxu0 %v429_v58 }
 0x21c   :  { %1438 = vmatprep.subr.mxu0 %v428_v59 }
 0x21d   :  { %1439 = vmatpush3.msra.mxu0 %v428_v59 }
 0x21e   :  { %1440 = vmatprep.subr.mxu0 %v427_v60 }
 0x21f   :  { %1441 = vmatpush3.msra.mxu0 %v427_v60 }
 0x220   :  { %1443 = vmatmul.mubr.f32.vlgmr.msra.gmra.mxu0 %v1841_v28  ;;  %v589_v28 = vld [vmem:[#allocation8 + $0x8] sm:$0xff] }
 0x221   :  { %1445 = vmatprep.mubr.f32.mxu0 %v1843_v30  ;;  %1494 = vmatprep.subr.mxu1 %v589_v28  ;;  %v588_v30 = vld [vmem:[#allocation8] sm:$0xff] }
 0x222   :  { %1495 = vmatpush3.msra.mxu1 %v589_v28 }
 0x223   :  { %1496 = vmatprep.subr.mxu1 %v588_v30 }
 0x224   :  { %1446 = vmatmul.mubr.f32.gmra.mxu0 %v1847_v32  ;;  %1497 = vmatpush3.msra.mxu1 %v588_v30  ;;  %v780_v32 = vld [vmem:[#allocation10 + $0x78] sm:$0xff] }
 0x225   :  { %1448 = vmatprep.mubr.f32.mxu0 %v1849_v34  ;;  %v779_v34 = vld [vmem:[#allocation10 + $0x70] sm:$0xff]  ;;  %1522 = vmatprep.subr.mxu0 %v780_v32 }
 0x226   :  { %1523 = vmatpush3.msra.mxu0 %v780_v32 }
 0x227   :  { %1524 = vmatprep.subr.mxu0 %v779_v34 }
 0x228   :  { %1449 = vmatmul.mubr.f32.gmra.mxu0 %v1853_v35  ;;  %v778_v35 = vld [vmem:[#allocation10 + $0x68] sm:$0xff] }
 0x229   :  { %1451 = vmatprep.mubr.f32.mxu0 %v1855_v36  ;;  %1525 = vmatpush3.msra.mxu0 %v779_v34  ;;  %v777_v36 = vld [vmem:[#allocation10 + $0x60] sm:$0xff] }
 0x22a   :  { %1526 = vmatprep.subr.mxu0 %v778_v35 }
 0x22b   :  { %1527 = vmatpush3.msra.mxu0 %v778_v35 }
 0x22c   :  { %1452 = vmatmul.mubr.f32.gmra.mxu0 %v1859_v37  ;;  %v776_v37 = vld [vmem:[#allocation10 + $0x58] sm:$0xff]  ;;  %1528 = vmatprep.subr.mxu0 %v777_v36 }
 0x22d   :  { %1454 = vmatprep.mubr.f32.mxu0 %v1861_v38  ;;  %1529 = vmatpush3.msra.mxu0 %v777_v36  ;;  %v775_v38 = vld [vmem:[#allocation10 + $0x50] sm:$0xff] }
 0x22e   :  { %1530 = vmatprep.subr.mxu0 %v776_v37 }
 0x22f   :  { %1531 = vmatpush3.msra.mxu0 %v776_v37 }
 0x230   :  { %1455 = vmatmul.mubr.f32.gmra.mxu0 %v1865_v39  ;;  %v774_v39 = vld [vmem:[#allocation10 + $0x48] sm:$0xff]  ;;  %1532 = vmatprep.subr.mxu0 %v775_v38 }
 0x231   :  { %1457 = vmatprep.mubr.f32.mxu0 %v1867_v40  ;;  %1533 = vmatpush3.msra.mxu0 %v775_v38  ;;  %v773_v40 = vld [vmem:[#allocation10 + $0x40] sm:$0xff] }
 0x232   :  { %1534 = vmatprep.subr.mxu0 %v774_v39 }
 0x233   :  { %1535 = vmatpush3.msra.mxu0 %v774_v39 }
 0x234   :  { %1458 = vmatmul.mubr.f32.gmra.mxu0 %v1871_v41  ;;  %v772_v41 = vld [vmem:[#allocation10 + $0x38] sm:$0xff]  ;;  %1536 = vmatprep.subr.mxu0 %v773_v40 }
 0x235   :  { %1460 = vmatprep.mubr.f32.mxu0 %v1873_v42  ;;  %1537 = vmatpush3.msra.mxu0 %v773_v40  ;;  %v771_v42 = vld [vmem:[#allocation10 + $0x30] sm:$0xff] }
 0x236   :  { %1538 = vmatprep.subr.mxu0 %v772_v41 }
 0x237   :  { %1539 = vmatpush3.msra.mxu0 %v772_v41 }
 0x238   :  { %1461 = vmatmul.mubr.f32.gmra.mxu0 %v1877_v43  ;;  %v770_v43 = vld [vmem:[#allocation10 + $0x28] sm:$0xff]  ;;  %1540 = vmatprep.subr.mxu0 %v771_v42 }
 0x239   :  { %1463 = vmatprep.mubr.f32.mxu0 %v1879_v44  ;;  %1541 = vmatpush3.msra.mxu0 %v771_v42  ;;  %v769_v44 = vld [vmem:[#allocation10 + $0x20] sm:$0xff] }
 0x23a   :  { %1542 = vmatprep.subr.mxu0 %v770_v43 }
 0x23b   :  { %1543 = vmatpush3.msra.mxu0 %v770_v43 }
 0x23c   :  { %1464 = vmatmul.mubr.f32.gmra.mxu0 %v1883_v45  ;;  %v768_v45 = vld [vmem:[#allocation10 + $0x18] sm:$0xff]  ;;  %1544 = vmatprep.subr.mxu0 %v769_v44 }
 0x23d   :  { %1545 = vmatpush3.msra.mxu0 %v769_v44 }
 0x23e   :  { %1546 = vmatprep.subr.mxu0 %v768_v45 }
 0x23f   :  { %1547 = vmatpush3.msra.mxu0 %v768_v45 }
 0x240   :  { %1548 = vmatprep.subr.mxu0 %v767_v13 }
 0x241   :  { %1549 = vmatpush3.msra.mxu0 %v767_v13 }
 0x242   :  { %1550 = vmatprep.subr.mxu0 %v766_v14 }
 0x243   :  { %1551 = vmatpush3.msra.mxu0 %v766_v14 }
 0x244   :  { %1552 = vmatprep.subr.mxu0 %v765_v15 }
 0x245   :  { %1553 = vmatpush3.msra.mxu0 %v765_v15 }
 0x2e0   :  { %v1444_v61 = vpop.f32.mrf.mxu0 }
 0x2e2   :  { %v509_v62 = vpop.f32.mrf.mxu0 }
 0x2e3   :  { %1498 = vmatprep.mubr.f32.mxu1 %v509_v62 }
 0x2e4   :  { %v1447_v63 = vpop.f32.mrf.mxu0  ;;  %1499 = vmatmul.mubr.f32.vlgmr.msra.gmra.mxu1 %v1444_v61 }
 0x2e6   :  { %v519_v0 = vpop.f32.mrf.mxu0 }
 0x2e7   :  { %1501 = vmatprep.mubr.f32.mxu1 %v519_v0 }
 0x2e8   :  { %v1450_v1 = vpop.f32.mrf.mxu0  ;;  %1502 = vmatmul.mubr.f32.gmra.mxu1 %v1447_v63 }
 0x2ea   :  { %v529_v2 = vpop.f32.mrf.mxu0 }
 0x2eb   :  { %1504 = vmatprep.mubr.f32.mxu1 %v529_v2 }
 0x2ec   :  { %v1453_v3 = vpop.f32.mrf.mxu0  ;;  %1505 = vmatmul.mubr.f32.gmra.mxu1 %v1450_v1 }
 0x2ee   :  { %v539_v4 = vpop.f32.mrf.mxu0 }
 0x2ef   :  { %1507 = vmatprep.mubr.f32.mxu1 %v539_v4 }
 0x2f0   :  { %v1456_v5 = vpop.f32.mrf.mxu0  ;;  %1508 = vmatmul.mubr.f32.gmra.mxu1 %v1453_v3 }
 0x2f2   :  { %v549_v6 = vpop.f32.mrf.mxu0 }
 0x2f3   :  { %1510 = vmatprep.mubr.f32.mxu1 %v549_v6 }
 0x2f4   :  { %v1459_v7 = vpop.f32.mrf.mxu0  ;;  %1511 = vmatmul.mubr.f32.gmra.mxu1 %v1456_v5 }
 0x2f6   :  { %v559_v8 = vpop.f32.mrf.mxu0 }
 0x2f7   :  { %1513 = vmatprep.mubr.f32.mxu1 %v559_v8 }
 0x2f8   :  { %v1462_v9 = vpop.f32.mrf.mxu0  ;;  %1514 = vmatmul.mubr.f32.gmra.mxu1 %v1459_v7 }
 0x2fa   :  { %v569_v10 = vpop.f32.mrf.mxu0 }
 0x2fb   :  { %1516 = vmatprep.mubr.f32.mxu1 %v569_v10 }
 0x2fc   :  { %v1465_v11 = vpop.f32.mrf.mxu0  ;;  %1517 = vmatmul.mubr.f32.gmra.mxu1 %v1462_v9 }
 0x2fe   :  { %v579_v12 = vpop.f32.mrf.mxu0 }
 0x2ff   :  { %1519 = vmatprep.mubr.f32.mxu1 %v579_v12 }
 0x300   :  { %1520 = vmatmul.mubr.f32.gmra.mxu1 %v1465_v11 }
 0x3a4   :  { %v1500_v16 = vpop.f32.mrf.mxu1 }
 0x3a5   :  { %v1904_v19 = vmax.f32 %v1500_v16, 0.0 }
 0x3a6   :  { %v670_v17 = vpop.f32.mrf.mxu1 }
 0x3a7   :  { %v1902_v18 = vmax.f32 %v670_v17, 0.0 }
 0x3a8   :  { %v1503_v20 = vpop.f32.mrf.mxu1 }
 0x3a9   :  { %1554 = vmatprep.mubr.f32.mxu0 %v1902_v18  ;;  %v1910_v23 = vmax.f32 %v1503_v20, 0.0 }
 0x3aa   :  { %v680_v21 = vpop.f32.mrf.mxu1  ;;  %1555 = vmatmul.mubr.f32.vlgmr.msra.gmra.mxu0 %v1904_v19 }
 0x3ab   :  { %v1908_v22 = vmax.f32 %v680_v21, 0.0 }
 0x3ac   :  { %v1506_v24 = vpop.f32.mrf.mxu1 }
 0x3ad   :  { %1557 = vmatprep.mubr.f32.mxu0 %v1908_v22  ;;  %v754_v27 = vmax.f32 %v1506_v24, 0.0 }
 0x3ae   :  { %v690_v25 = vpop.f32.mrf.mxu1  ;;  %1558 = vmatmul.mubr.f32.gmra.mxu0 %v1910_v23 }
 0x3af   :  { %v753_v26 = vmax.f32 %v690_v25, 0.0 }
 0x3b0   :  { %v1509_v29 = vpop.f32.mrf.mxu1 }
 0x3b1   :  { %1560 = vmatprep.mubr.f32.mxu0 %v753_v26  ;;  %v756_v46 = vmax.f32 %v1509_v29, 0.0 }
 0x3b2   :  { %v700_v31 = vpop.f32.mrf.mxu1  ;;  %1561 = vmatmul.mubr.f32.gmra.mxu0 %v754_v27 }
 0x3b3   :  { %v755_v33 = vmax.f32 %v700_v31, 0.0 }
 0x3b4   :  { %v1512_v47 = vpop.f32.mrf.mxu1 }
 0x3b5   :  { %1563 = vmatprep.mubr.f32.mxu0 %v755_v33  ;;  %v758_v50 = vmax.f32 %v1512_v47, 0.0 }
 0x3b6   :  { %v710_v48 = vpop.f32.mrf.mxu1  ;;  %1564 = vmatmul.mubr.f32.gmra.mxu0 %v756_v46 }
 0x3b7   :  { %v757_v49 = vmax.f32 %v710_v48, 0.0 }
 0x3b8   :  { %v1515_v51 = vpop.f32.mrf.mxu1 }
 0x3b9   :  { %1566 = vmatprep.mubr.f32.mxu0 %v757_v49  ;;  %v760_v54 = vmax.f32 %v1515_v51, 0.0 }
 0x3ba   :  { %v720_v52 = vpop.f32.mrf.mxu1  ;;  %1567 = vmatmul.mubr.f32.gmra.mxu0 %v758_v50 }
 0x3bb   :  { %v759_v53 = vmax.f32 %v720_v52, 0.0 }
 0x3bc   :  { %v1518_v55 = vpop.f32.mrf.mxu1 }
 0x3bd   :  { %1569 = vmatprep.mubr.f32.mxu0 %v759_v53  ;;  %v762_v58 = vmax.f32 %v1518_v55, 0.0 }
 0x3be   :  { %v730_v56 = vpop.f32.mrf.mxu1  ;;  %1570 = vmatmul.mubr.f32.gmra.mxu0 %v760_v54 }
 0x3bf   :  { %v761_v57 = vmax.f32 %v730_v56, 0.0 }
 0x3c0   :  { %v1521_v59 = vpop.f32.mrf.mxu1 }
 0x3c1   :  { %v764_v60 = vmax.f32 %v1521_v59, 0.0  ;;  %1572 = vmatprep.mubr.f32.mxu0 %v761_v57 }
 0x3c2   :  { %v740_v28 = vpop.f32.mrf.mxu1  ;;  %1573 = vmatmul.mubr.f32.gmra.mxu0 %v762_v58 }
 0x3c3   :  { %v763_v30 = vmax.f32 %v740_v28, 0.0  ;;  %1578 = vmatprep.subr.mxu1 %v764_v60 }
 0x3c4   :  { %1579 = vmatpush3.xpose.msra.mxu1 %v764_v60 }
 0x3c5   :  { %1575 = vmatprep.mubr.f32.mxu0 %v763_v30  ;;  %1580 = vmatprep.subr.mxu1 %v763_v30 }
 0x3c6   :  { %1576 = vmatmul.mubr.f32.gmra.mxu0 %v764_v60 }
 0x3c8   :  { %1581 = vmatpush3.xpose.msra.mxu1 %v763_v30 }
 0x3c9   :  { %1582 = vmatprep.subr.mxu1 %v762_v58 }
 0x3cc   :  { %1583 = vmatpush3.xpose.msra.mxu1 %v762_v58 }
 0x3cd   :  { %1584 = vmatprep.subr.mxu1 %v761_v57 }
 0x3d0   :  { %1585 = vmatpush3.xpose.msra.mxu1 %v761_v57 }
 0x3d1   :  { %1586 = vmatprep.subr.mxu1 %v760_v54 }
 0x3d4   :  { %1587 = vmatpush3.xpose.msra.mxu1 %v760_v54 }
 0x3d5   :  { %1588 = vmatprep.subr.mxu1 %v759_v53 }
 0x3d8   :  { %1589 = vmatpush3.xpose.msra.mxu1 %v759_v53 }
 0x3d9   :  { %1590 = vmatprep.subr.mxu1 %v758_v50 }
 0x3dc   :  { %1591 = vmatpush3.xpose.msra.mxu1 %v758_v50 }
 0x3dd   :  { %1592 = vmatprep.subr.mxu1 %v757_v49 }
 0x3e0   :  { %1593 = vmatpush3.xpose.msra.mxu1 %v757_v49 }
 0x3e1   :  { %1594 = vmatprep.subr.mxu1 %v756_v46 }
 0x3e4   :  { %1595 = vmatpush3.xpose.msra.mxu1 %v756_v46 }
 0x3e5   :  { %1596 = vmatprep.subr.mxu1 %v755_v33 }
 0x3e8   :  { %1597 = vmatpush3.xpose.msra.mxu1 %v755_v33 }
 0x3e9   :  { %1598 = vmatprep.subr.mxu1 %v754_v27 }
 0x3ec   :  { %1599 = vmatpush3.xpose.msra.mxu1 %v754_v27 }
 0x3ed   :  { %1600 = vmatprep.subr.mxu1 %v753_v26 }
 0x3f0   :  { %1601 = vmatpush3.xpose.msra.mxu1 %v753_v26 }
 0x3f1   :  { %1602 = vmatprep.subr.mxu1 %v1910_v23 }
 0x3f4   :  { %1603 = vmatpush3.xpose.msra.mxu1 %v1910_v23 }
 0x3f5   :  { %1604 = vmatprep.subr.mxu1 %v1908_v22 }
 0x3f8   :  { %1605 = vmatpush3.xpose.msra.mxu1 %v1908_v22 }
 0x3f9   :  { %1606 = vmatprep.subr.mxu1 %v1904_v19 }
 0x3fc   :  { %1607 = vmatpush3.xpose.msra.mxu1 %v1904_v19 }
 0x3fd   :  { %1608 = vmatprep.subr.mxu1 %v1902_v18 }
 0x400   :  { %1609 = vmatpush3.xpose.msra.mxu1 %v1902_v18 }
 0x46a   :  { %v1556_v32 = vpop.f32.mrf.mxu0 }
 0x46c   :  { %v847_v34 = vpop.f32.mrf.mxu0 }
 0x46d   :  { %1610 = vmatprep.mubr.f32.mxu1 %v847_v34 }
 0x46e   :  { %v1559_v35 = vpop.f32.mrf.mxu0  ;;  %1611 = vmatmul.mubr.f32.vlgmr.msra.gmra.mxu1 %v1556_v32 }
 0x470   :  { %v857_v36 = vpop.f32.mrf.mxu0 }
 0x471   :  { %1613 = vmatprep.mubr.f32.mxu1 %v857_v36 }
 0x472   :  { %v1562_v37 = vpop.f32.mrf.mxu0  ;;  %1614 = vmatmul.mubr.f32.gmra.mxu1 %v1559_v35 }
 0x474   :  { %v867_v38 = vpop.f32.mrf.mxu0 }
 0x475   :  { %1616 = vmatprep.mubr.f32.mxu1 %v867_v38 }
 0x476   :  { %v1565_v39 = vpop.f32.mrf.mxu0  ;;  %1617 = vmatmul.mubr.f32.gmra.mxu1 %v1562_v37 }
 0x478   :  { %v877_v40 = vpop.f32.mrf.mxu0 }
 0x479   :  { %1619 = vmatprep.mubr.f32.mxu1 %v877_v40 }
 0x47a   :  { %v1568_v41 = vpop.f32.mrf.mxu0  ;;  %1620 = vmatmul.mubr.f32.gmra.mxu1 %v1565_v39 }
 0x47c   :  { %v887_v42 = vpop.f32.mrf.mxu0 }
 0x47d   :  { %1622 = vmatprep.mubr.f32.mxu1 %v887_v42 }
 0x47e   :  { %v1571_v43 = vpop.f32.mrf.mxu0  ;;  %1623 = vmatmul.mubr.f32.gmra.mxu1 %v1568_v41 }
 0x480   :  { %v897_v44 = vpop.f32.mrf.mxu0 }
 0x481   :  { %1625 = vmatprep.mubr.f32.mxu1 %v897_v44 }
 0x482   :  { %v1574_v45 = vpop.f32.mrf.mxu0  ;;  %1626 = vmatmul.mubr.f32.gmra.mxu1 %v1571_v43 }
 0x484   :  { %v907_v61 = vpop.f32.mrf.mxu0 }
 0x485   :  { %1628 = vmatprep.mubr.f32.mxu1 %v907_v61 }
 0x486   :  { %v1577_v62 = vpop.f32.mrf.mxu0  ;;  %1629 = vmatmul.mubr.f32.gmra.mxu1 %v1574_v45 }
 0x488   :  { %v917_v63 = vpop.f32.mrf.mxu0 }
 0x489   :  { %1631 = vmatprep.mubr.f32.mxu1 %v917_v63 }
 0x48a   :  { %1632 = vmatmul.mubr.f32.gmra.mxu1 %v1577_v62 }
 0x52e   :  { %v1612_v0 = vpop.f32.mrf.mxu1 }
 0x52f   :  { %1072 = vst [vmem:[#allocation11 + $0x8] sm:$0xff] %v1612_v0 }
 0x530   :  { %v992_v1 = vpop.f32.mrf.mxu1 }
 0x531   :  { %1071 = vst [vmem:[#allocation11] sm:$0xff] %v992_v1 }
 0x532   :  { %v1615_v2 = vpop.f32.mrf.mxu1 }
 0x533   :  { %1074 = vst [vmem:[#allocation11 + $0x18] sm:$0xff] %v1615_v2 }
 0x534   :  { %v1002_v3 = vpop.f32.mrf.mxu1 }
 0x535   :  { %1073 = vst [vmem:[#allocation11 + $0x10] sm:$0xff] %v1002_v3 }
 0x536   :  { %v1618_v4 = vpop.f32.mrf.mxu1 }
 0x537   :  { %1076 = vst [vmem:[#allocation11 + $0x28] sm:$0xff] %v1618_v4 }
 0x538   :  { %v1012_v5 = vpop.f32.mrf.mxu1 }
 0x539   :  { %1075 = vst [vmem:[#allocation11 + $0x20] sm:$0xff] %v1012_v5 }
 0x53a   :  { %v1621_v6 = vpop.f32.mrf.mxu1 }
 0x53b   :  { %1078 = vst [vmem:[#allocation11 + $0x38] sm:$0xff] %v1621_v6 }
 0x53c   :  { %v1022_v7 = vpop.f32.mrf.mxu1 }
 0x53d   :  { %1077 = vst [vmem:[#allocation11 + $0x30] sm:$0xff] %v1022_v7 }
 0x53e   :  { %v1624_v8 = vpop.f32.mrf.mxu1 }
 0x53f   :  { %1080 = vst [vmem:[#allocation11 + $0x48] sm:$0xff] %v1624_v8 }
 0x540   :  { %v1032_v9 = vpop.f32.mrf.mxu1 }
 0x541   :  { %1079 = vst [vmem:[#allocation11 + $0x40] sm:$0xff] %v1032_v9 }
 0x542   :  { %v1627_v10 = vpop.f32.mrf.mxu1 }
 0x543   :  { %1082 = vst [vmem:[#allocation11 + $0x58] sm:$0xff] %v1627_v10 }
 0x544   :  { %v1042_v11 = vpop.f32.mrf.mxu1 }
 0x545   :  { %1081 = vst [vmem:[#allocation11 + $0x50] sm:$0xff] %v1042_v11 }
 0x546   :  { %v1630_v12 = vpop.f32.mrf.mxu1 }
 0x547   :  { %1084 = vst [vmem:[#allocation11 + $0x68] sm:$0xff] %v1630_v12 }
 0x548   :  { %v1052_v13 = vpop.f32.mrf.mxu1 }
 0x549   :  { %1083 = vst [vmem:[#allocation11 + $0x60] sm:$0xff] %v1052_v13 }
 0x54a   :  { %v1633_v14 = vpop.f32.mrf.mxu1 }
 0x54b   :  { %1086 = vst [vmem:[#allocation11 + $0x78] sm:$0xff] %v1633_v14 }
 0x54c   :  { %v1062_v15 = vpop.f32.mrf.mxu1 }
 0x54d   :  { %1085 = vst [vmem:[#allocation11 + $0x70] sm:$0xff] %v1062_v15 }
 0x54e   :  { %1753 = shalt.err (!%p1750_p1)
}
 0x54f   :  { %1098 = dma.vmem_to_hbm [thread:$0]  %s1093_s4, 2048, %s1933_s5, [#allocation4], %s1772_s23, %s1772_s23, %s1773_s24  }
 0x550   :  { %1768 = dma.done.wait [#allocation4], 2048  }
 0x551   :  { %1769 = vsyncadd [#allocation4], 4294965248 }
 0x552   :  { %1102 = vsyncpa [#allocation3], 1 }
 0x553   :  { %1103 = vsyncpa [#allocation6], 1 }
 0x554   :  { %1104 = vsyncpa [#allocation9], 1 }
 0x555   :  { %1105 = vsyncpa [#allocation4], 1 }

</bundles_post_ra>
